<compile_context>
chip_gen: v6e
topology: v6e:2x2x1
jax: 0.10.0
libtpu: 0.0.40
codegen_flags: <defaults>
</compile_context>

<pallas_src>
import functools

import numpy as np

import jax
import jax.numpy as jnp
from jax.experimental import pallas as pl
from jax.experimental.pallas import tpu as pltpu


def _round_up(x, m):
    return (x + m - 1) // m * m


# ----------------------------------------------------------------------------
# Kernel
# ----------------------------------------------------------------------------
def pwff_kernel(xr_ref, xi_ref, w1_ref, b1_ref, w2_ref, b2_ref, ln_ref,
                or_ref, oi_ref, *, d_in, d_in_pad, eps=1e-6):
    """One row-tile of the complex position-wise FFN.

    xr_ref/xi_ref : (tm, d_in_pad)            activation dtype (f32 or bf16)
    w1_ref        : (2*d_in_pad, 2*d_hid_pad) matmul dtype, [[w1r,w1i],[-w1i,w1r]]
    b1_ref        : (1, 2*d_hid_pad)  f32, packed bias [b1r-b1i | b1r+b1i]
    w2_ref        : (2*d_hid_pad, 2*d_in_pad) matmul dtype, [[w2r,w2i],[-w2i,w2r]]
    b2_ref        : (1, 2*d_in_pad)   f32, packed bias [b2r-b2i | b2r+b2i]
    ln_ref        : (8, d_in_pad)     f32, rows = [g_r, b_r, g_i, b_i, mask,0,0,0]
    or_ref/oi_ref : (tm, d_in_pad)    f32 outputs (LayerNorm_r / LayerNorm_i)
    """
    f32 = jnp.float32
    mm_dtype = w1_ref.dtype

    xr_raw = xr_ref[...]                       # (tm, d_in_pad) activation dtype
    xi_raw = xi_ref[...]
    xr = xr_raw.astype(f32)
    xi = xi_raw.astype(f32)

    # ---- complex linear 1: packed block matmul done as two K-halves + ReLU -
    #   [hr | hi] = [xr | xi] @ [[w1r, w1i], [-w1i, w1r]] + [b1r-b1i | b1r+b1i]
    h = jnp.dot(xr_raw.astype(mm_dtype), w1_ref[:d_in_pad, :],
                preferred_element_type=f32)
    h = h + jnp.dot(xi_raw.astype(mm_dtype), w1_ref[d_in_pad:, :],
                    preferred_element_type=f32)
    h = jnp.maximum(h + b1_ref[...], 0.0)      # (tm, 2*d_hid_pad) f32

    # ---- complex linear 2: single packed MXU matmul -------------------------
    y = jnp.dot(h.astype(mm_dtype), w2_ref[...],
                preferred_element_type=f32) + b2_ref[...]

    # dropout_r / dropout_i: identity in eval mode; residual add in f32.
    yr = y[:, :d_in_pad] + xr                  # 128-aligned lane halves
    yi = y[:, d_in_pad:] + xi

    g_r = ln_ref[0:1, :]
    b_r = ln_ref[1:2, :]
    g_i = ln_ref[2:3, :]
    b_i = ln_ref[3:4, :]
    mask = ln_ref[4:5, :]                      # 1 on true d_in lanes, 0 on pad
    inv_d = 1.0 / d_in

    def _layer_norm(v, gamma, beta):
        # Two-pass (centered) LayerNorm over the TRUE d_in lanes; padded
        # feature lanes of v are exactly zero and are masked out of the
        # variance so statistics match the unpadded reference bit-for-bit.
        mu = jnp.sum(v, axis=-1, keepdims=True) * inv_d
        c = (v - mu) * mask
        var = jnp.sum(c * c, axis=-1, keepdims=True) * inv_d
        return c * jax.lax.rsqrt(var + eps) * gamma + beta

    or_ref[...] = _layer_norm(yr, g_r, b_r).astype(or_ref.dtype)
    oi_ref[...] = _layer_norm(yi, g_i, b_i).astype(oi_ref.dtype)


# ----------------------------------------------------------------------------
# Parameter packing (block-matrix weights, padded to 128-multiples)
# ----------------------------------------------------------------------------
def pack_params(p, d_in, d_hid, d_in_pad, d_hid_pad, matmul_dtype):
    f32 = jnp.float32

    w1 = jnp.zeros((2 * d_in_pad, 2 * d_hid_pad), f32)
    w1 = w1.at[:d_in, :d_hid].set(p["w1r"])
    w1 = w1.at[:d_in, d_hid_pad:d_hid_pad + d_hid].set(p["w1i"])
    w1 = w1.at[d_in_pad:d_in_pad + d_in, :d_hid].set(-p["w1i"])
    w1 = w1.at[d_in_pad:d_in_pad + d_in, d_hid_pad:d_hid_pad + d_hid].set(p["w1r"])

    b1 = jnp.zeros((1, 2 * d_hid_pad), f32)
    b1 = b1.at[:, :d_hid].set(p["b1r"] - p["b1i"])
    b1 = b1.at[:, d_hid_pad:d_hid_pad + d_hid].set(p["b1r"] + p["b1i"])

    w2 = jnp.zeros((2 * d_hid_pad, 2 * d_in_pad), f32)
    w2 = w2.at[:d_hid, :d_in].set(p["w2r"])
    w2 = w2.at[:d_hid, d_in_pad:d_in_pad + d_in].set(p["w2i"])
    w2 = w2.at[d_hid_pad:d_hid_pad + d_hid, :d_in].set(-p["w2i"])
    w2 = w2.at[d_hid_pad:d_hid_pad + d_hid, d_in_pad:d_in_pad + d_in].set(p["w2r"])

    b2 = jnp.zeros((1, 2 * d_in_pad), f32)
    b2 = b2.at[:, :d_in].set(p["b2r"] - p["b2i"])
    b2 = b2.at[:, d_in_pad:d_in_pad + d_in].set(p["b2r"] + p["b2i"])

    ln = jnp.zeros((8, d_in_pad), f32)
    ln = ln.at[0, :d_in].set(p["ln_r_g"].reshape(-1))
    ln = ln.at[1, :d_in].set(p["ln_r_b"].reshape(-1))
    ln = ln.at[2, :d_in].set(p["ln_i_g"].reshape(-1))
    ln = ln.at[3, :d_in].set(p["ln_i_b"].reshape(-1))
    ln = ln.at[4, :d_in].set(1.0)                      # lane mask for LN var

    return w1.astype(matmul_dtype), b1, w2.astype(matmul_dtype), b2, ln


def _const_spec(shape):
    """Constant-index operand: single-buffered (no point double-buffering)."""
    index_map = lambda i: (0, 0)
    if hasattr(pl, "Buffered"):
        try:
            return pl.BlockSpec(shape, index_map, pipeline_mode=pl.Buffered(1))
        except Exception:
            pass
    return pl.BlockSpec(shape, index_map)


# ----------------------------------------------------------------------------
# Wrapper
# ----------------------------------------------------------------------------
def positionwise_feed_forward(x_r, x_i, params, *, row_tile=512,
                              matmul_dtype=jnp.float32,
                              activation_dtype=jnp.float32,
                              vmem_limit_bytes=None):
    """x_r, x_i: (..., d_in) float32. Returns (out_r, out_i), same shape, f32."""
    d_in = x_r.shape[-1]
    d_hid = params["w1r"].shape[1]
    orig_shape = x_r.shape

    xr2 = x_r.reshape(-1, d_in)
    xi2 = x_i.reshape(-1, d_in)
    n_rows = xr2.shape[0]

    d_in_pad = _round_up(d_in, 128)
    d_hid_pad = _round_up(d_hid, 128)

    # Row tiling: pick the grid first, then a balanced tile size (limits
    # padded-row waste); round big tiles to the 256-row MXU height; keep the
    # grid >= 2 whenever possible so the "parallel" row axis shards across the
    # two TensorCores on v7x.
    n_tiles = max(pl.cdiv(n_rows, row_tile), 1)
    if n_tiles == 1 and n_rows >= 16:
        n_tiles = 2
    tm = -(-n_rows // n_tiles)
    if tm >= 256:
        tm = _round_up(tm, 256)
    elif tm >= 128:
        tm = _round_up(tm, 128)
    else:
        tm = _round_up(max(tm, 8), 8)
    grid_n = pl.cdiv(n_rows, tm)
    n_pad = grid_n * tm

    # Pad only when actually needed (no packed activation copy; x_r / x_i
    # stream straight from HBM as separate lane-dense inputs).
    pad_cols = d_in_pad - d_in
    pad_rows = n_pad - n_rows
    if pad_cols or pad_rows:
        xr2 = jnp.pad(xr2, ((0, pad_rows), (0, pad_cols)))
        xi2 = jnp.pad(xi2, ((0, pad_rows), (0, pad_cols)))
    xr2 = xr2.astype(activation_dtype)
    xi2 = xi2.astype(activation_dtype)

    w1, b1, w2, b2, ln = pack_params(params, d_in, d_hid, d_in_pad, d_hid_pad,
                                     matmul_dtype)

    # VMEM budget from real buffer sizes (single-buffered weights +
    # double-buffered row streams + temporaries), with headroom, instead of a
    # hard-coded number.  For very large d_in/d_hid on v7x (64 MiB/TC) use
    # matmul_dtype=bfloat16; a d_hid reduction grid axis would be the next
    # step if weights still did not fit (not needed at these sizes).
    if vmem_limit_bytes is None:
        mm_b = np.dtype(matmul_dtype).itemsize
        act_b = np.dtype(activation_dtype).itemsize
        w_bytes = 2 * (2 * d_in_pad) * (2 * d_hid_pad) * mm_b
        small = (2 * d_hid_pad + 2 * d_in_pad) * 4 + 8 * d_in_pad * 4
        io_bytes = 2 * (2 * tm * d_in_pad * act_b) + 2 * (2 * tm * d_in_pad * 4)
        tmp = (tm * 2 * d_hid_pad * (4 + mm_b) + tm * 2 * d_in_pad * 4
               + 2 * tm * d_in_pad * 4)
        est = w_bytes + small + io_bytes + tmp
        vmem_limit_bytes = int(min(100 << 20,
                                   max(32 << 20, est * 3 // 2 + (4 << 20))))

    row_spec = pl.BlockSpec((tm, d_in_pad), lambda i: (i, 0))

    kernel = functools.partial(pwff_kernel, d_in=d_in, d_in_pad=d_in_pad)

    out_r, out_i = pl.pallas_call(
        kernel,
        out_shape=(jax.ShapeDtypeStruct((n_pad, d_in_pad), jnp.float32),
                   jax.ShapeDtypeStruct((n_pad, d_in_pad), jnp.float32)),
        grid_spec=pltpu.PrefetchScalarGridSpec(
            num_scalar_prefetch=0,
            grid=(grid_n,),
            in_specs=[
                row_spec,                                    # x_r row tile
                row_spec,                                    # x_i row tile
                _const_spec((2 * d_in_pad, 2 * d_hid_pad)),  # packed W1
                _const_spec((1, 2 * d_hid_pad)),             # packed b1
                _const_spec((2 * d_hid_pad, 2 * d_in_pad)),  # packed W2
                _const_spec((1, 2 * d_in_pad)),              # packed b2
                _const_spec((8, d_in_pad)),                  # LN params + mask
            ],
            out_specs=[row_spec, row_spec],
        ),
        compiler_params=pltpu.CompilerParams(
            dimension_semantics=("parallel",),
            vmem_limit_bytes=vmem_limit_bytes,
        ),
    )(xr2, xi2, w1, b1, w2, b2, ln)

    if pad_cols or pad_rows:
        out_r = out_r[:n_rows, :d_in]
        out_i = out_i[:n_rows, :d_in]
    return out_r.reshape(orig_shape), out_i.reshape(orig_shape)


# ----------------------------------------------------------------------------
# Init + pure-JAX reference
# ----------------------------------------------------------------------------
def init_params(key, d_in, d_hid):
    """Deterministic synthetic init (shapes match nn.Linear / nn.LayerNorm)."""
    ks = jax.random.split(key, 8)
    s1 = 1.0 / jnp.sqrt(d_in)
    s2 = 1.0 / jnp.sqrt(d_hid)
    # nn.Linear stores weight as (out, in); we pre-transpose to (in, out).
    return {
        "w1r": jax.random.uniform(ks[0], (d_in, d_hid), jnp.float32, -s1, s1),
        "w1i": jax.random.uniform(ks[1], (d_in, d_hid), jnp.float32, -s1, s1),
        "b1r": jax.random.uniform(ks[2], (1, d_hid), jnp.float32, -s1, s1),
        "b1i": jax.random.uniform(ks[3], (1, d_hid), jnp.float32, -s1, s1),
        "w2r": jax.random.uniform(ks[4], (d_hid, d_in), jnp.float32, -s2, s2),
        "w2i": jax.random.uniform(ks[5], (d_hid, d_in), jnp.float32, -s2, s2),
        "b2r": jax.random.uniform(ks[6], (1, d_in), jnp.float32, -s2, s2),
        "b2i": jax.random.uniform(ks[7], (1, d_in), jnp.float32, -s2, s2),
        "ln_r_g": jnp.ones((1, d_in), jnp.float32),
        "ln_r_b": jnp.zeros((1, d_in), jnp.float32),
        "ln_i_g": jnp.ones((1, d_in), jnp.float32),
        "ln_i_b": jnp.zeros((1, d_in), jnp.float32),
    }


def _reference(x_r, x_i, p, eps=1e-6):
    """Pure-JAX reference matching the PyTorch forward (eval-mode dropout)."""
    def ln(y, g, b):
        mu = jnp.mean(y, axis=-1, keepdims=True)
        var = jnp.mean((y - mu) ** 2, axis=-1, keepdims=True)
        return (y - mu) * jax.lax.rsqrt(var + eps) * g + b

    w1r = lambda x: x @ p["w1r"] + p["b1r"]
    w1i = lambda x: x @ p["w1i"] + p["b1i"]
    w2r = lambda x: x @ p["w2r"] + p["b2r"]
    w2i = lambda x: x @ p["w2i"] + p["b2i"]
    hr = jax.nn.relu(w1r(x_r) - w1i(x_i))
    hi = jax.nn.relu(w1i(x_r) + w1r(x_i))
    yr = (w2r(hr) - w2i(hi)) + x_r
    yi = (w2i(hr) + w2r(hi)) + x_i
    return ln(yr, p["ln_r_g"], p["ln_r_b"]), ln(yi, p["ln_i_g"], p["ln_i_b"])


if __name__ == "__main__":
    batch, seq, d_in, d_hid = 2, 8, 32, 64

    key = jax.random.PRNGKey(0)
    k_xr, k_xi, k_p = jax.random.split(key, 3)
    x_r = jax.random.normal(k_xr, (batch, seq, d_in), jnp.float32)
    x_i = jax.random.normal(k_xi, (batch, seq, d_in), jnp.float32)
    params = init_params(k_p, d_in, d_hid)

    ref_r, ref_i = _reference(x_r.reshape(-1, d_in), x_i.reshape(-1, d_in), params)

    # f32 matmul path (bit-faithful reference path).
    out_r, out_i = positionwise_feed_forward(x_r, x_i, params)
    jax.block_until_ready((out_r, out_i))
    assert jnp.allclose(out_r.reshape(-1, d_in), ref_r, atol=1e-4, rtol=1e-4)
    assert jnp.allclose(out_i.reshape(-1, d_in), ref_i, atol=1e-4, rtol=1e-4)

    # bf16 MXU-operand + bf16 activation-streaming fast path (v6e/v7x, also
    # beneficial on v5e's bf16-native MXU); f32 accumulation + f32 epilogue.
    out_rb, out_ib = positionwise_feed_forward(
        x_r, x_i, params,
        matmul_dtype=jnp.bfloat16, activation_dtype=jnp.bfloat16)
    jax.block_until_ready((out_rb, out_ib))
    assert jnp.allclose(out_rb.reshape(-1, d_in), ref_r, atol=1e-1, rtol=1e-1)
    assert jnp.allclose(out_ib.reshape(-1, d_in), ref_i, atol=1e-1, rtol=1e-1)

    print("KERNEL_OK")
</pallas_src>

<mosaic_0001>
module attributes {stable_mosaic.version = 11 : i64} {
  func.func @pwff_kernel(%arg0: i32, %arg1: memref<8x128xf32, #tpu.memory_space<vmem>>, %arg2: memref<8x128xf32, #tpu.memory_space<vmem>>, %arg3: memref<256x256xf32, #tpu.memory_space<vmem>>, %arg4: memref<1x256xf32, #tpu.memory_space<vmem>>, %arg5: memref<256x256xf32, #tpu.memory_space<vmem>>, %arg6: memref<1x256xf32, #tpu.memory_space<vmem>>, %arg7: memref<8x128xf32, #tpu.memory_space<vmem>>, %arg8: memref<8x128xf32, #tpu.memory_space<vmem>>, %arg9: memref<8x128xf32, #tpu.memory_space<vmem>>) attributes {dimension_semantics = [#tpu.dimension_semantics<parallel>], iteration_bounds = array<i64: 2>, scalar_prefetch = 0 : i64, scratch_operands = 0 : i64, tpu.core_type = #tpu.core_type<tc>, window_params = [{transform_indices = @transform_0, window_bounds = array<i64: 8, 128>}, {transform_indices = @transform_1, window_bounds = array<i64: 8, 128>}, {pipeline_mode = #tpu.pipeline_mode<synchronous>, transform_indices = @transform_2, window_bounds = array<i64: 256, 256>}, {pipeline_mode = #tpu.pipeline_mode<synchronous>, transform_indices = @transform_3, window_bounds = array<i64: 1, 256>}, {pipeline_mode = #tpu.pipeline_mode<synchronous>, transform_indices = @transform_4, window_bounds = array<i64: 256, 256>}, {pipeline_mode = #tpu.pipeline_mode<synchronous>, transform_indices = @transform_5, window_bounds = array<i64: 1, 256>}, {pipeline_mode = #tpu.pipeline_mode<synchronous>, transform_indices = @transform_6, window_bounds = array<i64: 8, 128>}, {transform_indices = @transform_7, window_bounds = array<i64: 8, 128>}, {transform_indices = @transform_8, window_bounds = array<i64: 8, 128>}]} {
    %c0 = arith.constant 0 : index
    %c0_0 = arith.constant 0 : index
    %0 = vector.load %arg1[%c0, %c0_0] : memref<8x128xf32, #tpu.memory_space<vmem>>, vector<8x128xf32>
    %c0_1 = arith.constant 0 : index
    %c0_2 = arith.constant 0 : index
    %1 = vector.load %arg2[%c0_1, %c0_2] : memref<8x128xf32, #tpu.memory_space<vmem>>, vector<8x128xf32>
    %c0_3 = arith.constant 0 : index
    %c0_4 = arith.constant 0 : index
    %2 = vector.load %arg3[%c0_3, %c0_4] : memref<256x256xf32, #tpu.memory_space<vmem>>, vector<128x256xf32>
    %cst = arith.constant dense<0.000000e+00> : vector<8x256xf32>
    %3 = tpu.matmul %0, %2, %cst {dimension_numbers = #tpu.dot_dimension_numbers<[1], [0], [0], [1], [0, 0, 1, 1], [], []>} : vector<8x128xf32>, vector<128x256xf32>, vector<8x256xf32> -> vector<8x256xf32>
    %c128 = arith.constant 128 : index
    %c0_5 = arith.constant 0 : index
    %4 = vector.load %arg3[%c128, %c0_5] : memref<256x256xf32, #tpu.memory_space<vmem>>, vector<128x256xf32>
    %cst_6 = arith.constant dense<0.000000e+00> : vector<8x256xf32>
    %5 = tpu.matmul %1, %4, %cst_6 {dimension_numbers = #tpu.dot_dimension_numbers<[1], [0], [0], [1], [0, 0, 1, 1], [], []>} : vector<8x128xf32>, vector<128x256xf32>, vector<8x256xf32> -> vector<8x256xf32>
    %6 = arith.addf %3, %5 : vector<8x256xf32>
    %c0_7 = arith.constant 0 : index
    %c0_8 = arith.constant 0 : index
    %7 = vector.load %arg4[%c0_7, %c0_8] : memref<1x256xf32, #tpu.memory_space<vmem>>, vector<1x256xf32>
    %8 = vector.broadcast %7 : vector<1x256xf32> to vector<8x256xf32>
    %9 = arith.addf %6, %8 : vector<8x256xf32>
    %cst_9 = arith.constant 0.000000e+00 : f32
    %10 = vector.broadcast %cst_9 : f32 to vector<8x256xf32>
    %11 = arith.maximumf %9, %10 : vector<8x256xf32>
    %c0_10 = arith.constant 0 : index
    %c0_11 = arith.constant 0 : index
    %12 = vector.load %arg5[%c0_10, %c0_11] : memref<256x256xf32, #tpu.memory_space<vmem>>, vector<256x256xf32>
    %cst_12 = arith.constant dense<0.000000e+00> : vector<8x256xf32>
    %13 = tpu.matmul %11, %12, %cst_12 {dimension_numbers = #tpu.dot_dimension_numbers<[1], [0], [0], [1], [0, 0, 1, 1], [], []>} : vector<8x256xf32>, vector<256x256xf32>, vector<8x256xf32> -> vector<8x256xf32>
    %c0_13 = arith.constant 0 : index
    %c0_14 = arith.constant 0 : index
    %14 = vector.load %arg6[%c0_13, %c0_14] : memref<1x256xf32, #tpu.memory_space<vmem>>, vector<1x256xf32>
    %15 = vector.broadcast %14 : vector<1x256xf32> to vector<8x256xf32>
    %16 = arith.addf %13, %15 : vector<8x256xf32>
    %17 = vector.extract_strided_slice %16 {offsets = [0, 0], sizes = [8, 128], strides = [1, 1]} : vector<8x256xf32> to vector<8x128xf32>
    %18 = arith.addf %17, %0 : vector<8x128xf32>
    %19 = vector.extract_strided_slice %16 {offsets = [0, 128], sizes = [8, 128], strides = [1, 1]} : vector<8x256xf32> to vector<8x128xf32>
    %20 = arith.addf %19, %1 : vector<8x128xf32>
    %c0_15 = arith.constant 0 : index
    %c0_16 = arith.constant 0 : index
    %21 = vector.load %arg7[%c0_15, %c0_16] : memref<8x128xf32, #tpu.memory_space<vmem>>, vector<1x128xf32>
    %c1 = arith.constant 1 : index
    %c0_17 = arith.constant 0 : index
    %22 = vector.load %arg7[%c1, %c0_17] : memref<8x128xf32, #tpu.memory_space<vmem>>, vector<1x128xf32>
    %c2 = arith.constant 2 : index
    %c0_18 = arith.constant 0 : index
    %23 = vector.load %arg7[%c2, %c0_18] : memref<8x128xf32, #tpu.memory_space<vmem>>, vector<1x128xf32>
    %c3 = arith.constant 3 : index
    %c0_19 = arith.constant 0 : index
    %24 = vector.load %arg7[%c3, %c0_19] : memref<8x128xf32, #tpu.memory_space<vmem>>, vector<1x128xf32>
    %c4 = arith.constant 4 : index
    %c0_20 = arith.constant 0 : index
    %25 = vector.load %arg7[%c4, %c0_20] : memref<8x128xf32, #tpu.memory_space<vmem>>, vector<1x128xf32>
    %cst_21 = arith.constant dense<0.000000e+00> : vector<8xf32>
    %26 = vector.multi_reduction <add>, %18, %cst_21 [1] : vector<8x128xf32> to vector<8xf32>
    %27 = vector.shape_cast %26 : vector<8xf32> to vector<8x1xf32>
    %cst_22 = arith.constant 3.125000e-02 : f32
    %28 = vector.broadcast %cst_22 : f32 to vector<8x1xf32>
    %29 = arith.mulf %27, %28 : vector<8x1xf32>
    %30 = vector.broadcast %29 : vector<8x1xf32> to vector<8x128xf32>
    %31 = arith.subf %18, %30 : vector<8x128xf32>
    %32 = vector.broadcast %25 : vector<1x128xf32> to vector<8x128xf32>
    %33 = arith.mulf %31, %32 : vector<8x128xf32>
    %34 = arith.mulf %33, %33 : vector<8x128xf32>
    %cst_23 = arith.constant dense<0.000000e+00> : vector<8xf32>
    %35 = vector.multi_reduction <add>, %34, %cst_23 [1] : vector<8x128xf32> to vector<8xf32>
    %36 = vector.shape_cast %35 : vector<8xf32> to vector<8x1xf32>
    %cst_24 = arith.constant 3.125000e-02 : f32
    %37 = vector.broadcast %cst_24 : f32 to vector<8x1xf32>
    %38 = arith.mulf %36, %37 : vector<8x1xf32>
    %cst_25 = arith.constant 9.99999997E-7 : f32
    %39 = vector.broadcast %cst_25 : f32 to vector<8x1xf32>
    %40 = arith.addf %38, %39 : vector<8x1xf32>
    %41 = math.rsqrt %40 : vector<8x1xf32>
    %42 = vector.broadcast %41 : vector<8x1xf32> to vector<8x128xf32>
    %43 = arith.mulf %33, %42 : vector<8x128xf32>
    %44 = vector.broadcast %21 : vector<1x128xf32> to vector<8x128xf32>
    %45 = arith.mulf %43, %44 : vector<8x128xf32>
    %46 = vector.broadcast %22 : vector<1x128xf32> to vector<8x128xf32>
    %47 = arith.addf %45, %46 : vector<8x128xf32>
    %c0_26 = arith.constant 0 : index
    %c0_27 = arith.constant 0 : index
    %48 = vector.load %arg8[%c0_26, %c0_27] : memref<8x128xf32, #tpu.memory_space<vmem>>, vector<8x128xf32>
    tpu.vector_store %arg8[%c0_26, %c0_27], %47 {strides = array<i32>} : memref<8x128xf32, #tpu.memory_space<vmem>>, vector<8x128xf32>,
    %cst_28 = arith.constant dense<0.000000e+00> : vector<8xf32>
    %49 = vector.multi_reduction <add>, %20, %cst_28 [1] : vector<8x128xf32> to vector<8xf32>
    %50 = vector.shape_cast %49 : vector<8xf32> to vector<8x1xf32>
    %cst_29 = arith.constant 3.125000e-02 : f32
    %51 = vector.broadcast %cst_29 : f32 to vector<8x1xf32>
    %52 = arith.mulf %50, %51 : vector<8x1xf32>
    %53 = vector.broadcast %52 : vector<8x1xf32> to vector<8x128xf32>
    %54 = arith.subf %20, %53 : vector<8x128xf32>
    %55 = vector.broadcast %25 : vector<1x128xf32> to vector<8x128xf32>
    %56 = arith.mulf %54, %55 : vector<8x128xf32>
    %57 = arith.mulf %56, %56 : vector<8x128xf32>
    %cst_30 = arith.constant dense<0.000000e+00> : vector<8xf32>
    %58 = vector.multi_reduction <add>, %57, %cst_30 [1] : vector<8x128xf32> to vector<8xf32>
    %59 = vector.shape_cast %58 : vector<8xf32> to vector<8x1xf32>
    %cst_31 = arith.constant 3.125000e-02 : f32
    %60 = vector.broadcast %cst_31 : f32 to vector<8x1xf32>
    %61 = arith.mulf %59, %60 : vector<8x1xf32>
    %cst_32 = arith.constant 9.99999997E-7 : f32
    %62 = vector.broadcast %cst_32 : f32 to vector<8x1xf32>
    %63 = arith.addf %61, %62 : vector<8x1xf32>
    %64 = math.rsqrt %63 : vector<8x1xf32>
    %65 = vector.broadcast %64 : vector<8x1xf32> to vector<8x128xf32>
    %66 = arith.mulf %56, %65 : vector<8x128xf32>
    %67 = vector.broadcast %23 : vector<1x128xf32> to vector<8x128xf32>
    %68 = arith.mulf %66, %67 : vector<8x128xf32>
    %69 = vector.broadcast %24 : vector<1x128xf32> to vector<8x128xf32>
    %70 = arith.addf %68, %69 : vector<8x128xf32>
    %c0_33 = arith.constant 0 : index
    %c0_34 = arith.constant 0 : index
    %71 = vector.load %arg9[%c0_33, %c0_34] : memref<8x128xf32, #tpu.memory_space<vmem>>, vector<8x128xf32>
    tpu.vector_store %arg9[%c0_33, %c0_34], %70 {strides = array<i32>} : memref<8x128xf32, #tpu.memory_space<vmem>>, vector<8x128xf32>,
    return
  }
  func.func @transform_0(%arg0: i32) -> (i32, i32) {
    %c0_i32 = arith.constant 0 : i32
    %c0_i32_0 = arith.constant 0 : i32
    return %arg0, %c0_i32 : i32, i32
  }
  func.func @transform_1(%arg0: i32) -> (i32, i32) {
    %c0_i32 = arith.constant 0 : i32
    %c0_i32_0 = arith.constant 0 : i32
    return %arg0, %c0_i32 : i32, i32
  }
  func.func @transform_2(%arg0: i32) -> (i32, i32) {
    %c0_i32 = arith.constant 0 : i32
    %c0_i32_0 = arith.constant 0 : i32
    %c0_i32_1 = arith.constant 0 : i32
    return %c0_i32, %c0_i32_0 : i32, i32
  }
  func.func @transform_3(%arg0: i32) -> (i32, i32) {
    %c0_i32 = arith.constant 0 : i32
    %c0_i32_0 = arith.constant 0 : i32
    %c0_i32_1 = arith.constant 0 : i32
    return %c0_i32, %c0_i32_0 : i32, i32
  }
  func.func @transform_4(%arg0: i32) -> (i32, i32) {
    %c0_i32 = arith.constant 0 : i32
    %c0_i32_0 = arith.constant 0 : i32
    %c0_i32_1 = arith.constant 0 : i32
    return %c0_i32, %c0_i32_0 : i32, i32
  }
  func.func @transform_5(%arg0: i32) -> (i32, i32) {
    %c0_i32 = arith.constant 0 : i32
    %c0_i32_0 = arith.constant 0 : i32
    %c0_i32_1 = arith.constant 0 : i32
    return %c0_i32, %c0_i32_0 : i32, i32
  }
  func.func @transform_6(%arg0: i32) -> (i32, i32) {
    %c0_i32 = arith.constant 0 : i32
    %c0_i32_0 = arith.constant 0 : i32
    %c0_i32_1 = arith.constant 0 : i32
    return %c0_i32, %c0_i32_0 : i32, i32
  }
  func.func @transform_7(%arg0: i32) -> (i32, i32) {
    %c0_i32 = arith.constant 0 : i32
    %c0_i32_0 = arith.constant 0 : i32
    return %arg0, %c0_i32 : i32, i32
  }
  func.func @transform_8(%arg0: i32) -> (i32, i32) {
    %c0_i32 = arith.constant 0 : i32
    %c0_i32_0 = arith.constant 0 : i32
    return %arg0, %c0_i32 : i32, i32
  }
}

</mosaic_0001>

<bundles_post_ra>
// kernel: tpu_custom_call.1
= control target key start
LH: loop header
LB: loop body
LE: loop exit
PB: predicated region body
PF: predicated region fallthrough
CT: control target
= control target key end

     0   :  { %s1736_s0 = inlined_call_operand.hbm [shape: f32[16,128], index: 0, kind: input, shape index: {}]   ;;  %s1737_s1 = inlined_call_operand.hbm [shape: f32[16,128], index: 1, kind: input, shape index: {}]   ;;  %s1738_s2 = inlined_call_operand.hbm [shape: f32[256,256], index: 2, kind: input, shape index: {}]   ;;  %s1739_s3 = inlined_call_operand.vmem [shape: f32[1,256], index: 3, kind: input, shape index: {}]   ;;  %s1740_s4 = inlined_call_operand.hbm [shape: f32[256,256], index: 4, kind: input, shape index: {}]   ;;  %s1741_s5 = inlined_call_operand.hbm [shape: f32[1,256], index: 5, kind: input, shape index: {}]   ;;  %s1742_s6 = inlined_call_operand.vmem [shape: f32[8,128], index: 6, kind: input, shape index: {}]   ;;  %s1743_s7 = inlined_call_operand.hbm [shape: f32[16,128], index: 7, kind: output, shape index: {0}]   ;;  %s1744_s8 = inlined_call_operand.hbm [shape: f32[16,128], index: 8, kind: output, shape index: {1}]  }
   0x1   :  { %1750 = sst [smem:[#allocation22_spill]] %s1738_s2 }
   0x2   :  { %1751 = sst [smem:[#allocation23_spill]] %s1740_s4 }
   0x3   :  { %1752 = sst [smem:[#allocation24_spill]] %s1741_s5 }
   0x4   :  { %14 = vsyncpa [#allocation3], 0 }
   0x5   :  { %16 = vsyncpa [#allocation3 + $0x1], 0 }
   0x6   :  { %17 = vsyncpa [#allocation6], 0 }
   0x7   :  { %19 = vsyncpa [#allocation6 + $0x1], 0 }
   0x8   :  { %20 = vsyncpa [#allocation9], 0 }
   0x9   :  { %21 = vsyncpa [#allocation4], 0 }
   0xa   :  { %23 = vsyncpa [#allocation4 + $0x1], 0 }
   0xb   :  { %24 = vsyncpa [#allocation13], 0 }
   0xc   :  { %26 = vsyncpa [#allocation13 + $0x1], 0  ;;  %s1443_s27 = smov 0   ;;  %s1445_s28 = smov 0  }
   0xd   :  { %s1447_s29 = smov 0   ;;  %s1449_s30 = smov 0  }
   0xe LB: > { %1753 = sst [smem:[#allocation20_spill]] %s1382_s29  ;;  %s1464_s9 = sadd.s32 4294967295, %s1386_s30   ;;  %s1386_s30 = sphi %s1449_s30, %s1778_s30   ;;  %s1382_s29 = sphi %s1447_s29, %s1775_s29   ;;  %s1378_s28 = sphi %s1445_s28, %s1777_s28   ;;  %s1374_s27 = sphi %s1443_s27, %s1776_s27  }
   0xf   : > { %s1023_s10 = sadd.s32 4294967294, %s1386_s30   ;;  %p52_p0 = scmp.ne.s32.totalorder %s1378_s28, %s1374_s27 }
  0x10   : > { %p1745_p1 = scmp.eq.s32.totalorder %s1464_s9, 0  ;;  %p213_p3 = scmp.eq.s32.totalorder %s1023_s10, 1 }
  0x11   : > { %p1024_p5 = scmp.ge.s32.totalorder %s1386_s30, 1  ;;  %p246_p7 = scmp.lt.s32.totalorder %s1386_s30, 3 }
  0x12   : > { %p1473_p4 = por %p1745_p1, %p52_p0  ;;  %p1478_p6 = por %p213_p3, %p52_p0 }
  0x13   : > { %p1483_p8 = pnand %p1024_p5, %p246_p7  ;;  %s1388_s14 = smov [#allocation7]  }
  0x14   : > { %s1754_s11 = scalar_select %p1473_p4, 1, 0 }
  0x15   : > { %s1755_s12 = scalar_select %p1478_p6, 1, 0 }
  0x16   : > { %s1756_s13 = scalar_select %p1483_p8, 1, 0 }
  0x17   : > { %s258_s15 = sshll.u32 %s1388_s14, 4  ;;  %p1072_p9 = pneg %p1483_p8  ;;  %s259_s15 = int_to_ptr.vmem [resolvable:$true] %s258_s15 }
  0x18   : > { %s1389_s17 = smov [#allocation8]   ;;  %s1390_s19 = smov [#allocation10]  }
  0x19   : > { %p1492_p11 = pnand %p1072_p9, %p1745_p1  ;;  %s274_s18 = sshll.u32 %s1389_s17, 4  ;;  %s275_s18 = int_to_ptr.vmem [resolvable:$true] %s274_s18 }
  0x1a   : > { %s288_s20 = sshll.u32 %s1390_s19, 4  ;;  %s1157_s21 = scalar_lea.vmem %s259_s15, 8192  ;;  %s289_s20 = int_to_ptr.vmem [resolvable:$true] %s288_s20 }
  0x1b   : > { %p1148_p12 = pneg %p1492_p11  ;;  %p1158_p13 = scmp.ne.s32.totalorder %s259_s15, %s1157_s21 }
  0x1c   : > { %p1165_p5 = scmp.lt.s32.totalorder %s259_s15, %s259_s15  ;;  %p1166_p7 = scmp.lt.s32.totalorder %s1157_s21, %s1157_s21 }
  0x1d   : > { %p1160_p0 = pnand %p1158_p13, %p1148_p12 }
  0x1e   : > { %p1167_p9 = por %p1166_p7, %p1165_p5 }
  0x1f   : > { %p1161_p3 = pneg %p1160_p0 }
  0x21   : > { %p1168_p10 = pnand %p1167_p9, %p1161_p3 }
  0x23   : > { %1171 = shalt.err (!%p1168_p10)
}
  0x24   : > { %s1391_s22 = smov 256   ;;  %s1392_s23 = smov 16  }
  0x25   : > { %s1758_s2 = sld [smem:[#allocation22_spill]]  ;;  %s1183_s26 = scalar_lea.vmem %s275_s18, 8192 }
  0x26   : > { %p1184_p1 = scmp.ne.s32.totalorder %s275_s18, %s1183_s26  ;;  %p1191_p2 = scmp.lt.s32.totalorder %s275_s18, %s275_s18 }
  0x27   : > { %p1192_p6 = scmp.lt.s32.totalorder %s1183_s26, %s1183_s26 }
  0x28   : > { %p1186_p13 = pnand %p1184_p1, %p1148_p12 }
  0x29   : > { %p1193_p5 = por %p1192_p6, %p1191_p2 }
  0x2a   : > { %p1187_p0 = pneg %p1186_p13 }
  0x2b   : > { %1075 = dma.hbm_to_vmem [thread:$0]  (!%p1492_p11), %s1758_s2, 8192, %s259_s15, [#allocation6], %s1391_s22, %s1391_s22, %s1392_s23  }
  0x2c   : > { %p1194_p3 = pnand %p1193_p5, %p1187_p0 }
  0x2e   : > { %1197 = shalt.err (!%p1194_p3)
}
  0x2f   : > { %s1759_s4 = sld [smem:[#allocation23_spill]]  ;;  %s1209_s15 = scalar_lea.vmem %s289_s20, 32 }
  0x30   : > { %p1210_p10 = scmp.ne.s32.totalorder %s289_s20, %s1209_s15  ;;  %p1217_p9 = scmp.lt.s32.totalorder %s289_s20, %s289_s20 }
  0x31   : > { %p1218_p13 = scmp.lt.s32.totalorder %s1209_s15, %s1209_s15 }
  0x32   : > { %p1212_p7 = pnand %p1210_p10, %p1148_p12 }
  0x33   : > { %p1219_p4 = por %p1218_p13, %p1217_p9 }
  0x34   : > { %p1213_p1 = pneg %p1212_p7 }
  0x35   : > { %1078 = dma.hbm_to_vmem [thread:$0]  (!%p1492_p11), %s1759_s4, 8192, %s275_s18, [#allocation9], %s1391_s22, %s1391_s22, %s1392_s23  }
  0x36   : > { %p1220_p2 = pnand %p1219_p4, %p1213_p1 }
  0x38   : > { %1223 = shalt.err (!%p1220_p2)
}
  0x39   : > { %s1760_s5 = sld [smem:[#allocation24_spill]]  ;;  %s1523_s18 = sadd.s32 1, %s1386_s30  }
  0x3a   : > { %s36_s21 = ssub.s32 %s1386_s30, %s1523_s18  ;;  %s39_s16 = sadd.s32 1, %s1382_s29 }
  0x3b   : > { %p37_p4 = scmp.eq.s32.totalorder %s36_s21, 0  ;;  %p46_p6 = scmp.ne.s32.totalorder %s1382_s29, %s1378_s28 }
  0x3c   : > { %p47_p12 = scmp.eq.s32.totalorder %s1386_s30, 0  ;;  %p1099_p0 = scmp.lt.s32.totalorder %s1386_s30, 2 }
  0x3d   : > { %s1533_s22 = scalar_select %p37_p4, %s1382_s29, %s39_s16  }
  0x3e   : > { %p48_p5 = por %p47_p12, %p46_p6  ;;  %p1762_p3 = scmp.eq.s32.totalorder %s1464_s9, 1 }
  0x3f   : > { %1081 = dma.hbm_to_vmem [thread:$0]  (!%p1492_p11), %s1760_s5, 32, %s289_s20, [#allocation9]  }
  0x40   : > { %1761 = sst [smem:[#allocation21_spill]] %s1533_s22  ;;  %p1537_p10 = por %p1762_p3, %p46_p6 }
  0x41   : > { %s302_s24 = sand.u32 1, %s1382_s29   ;;  %s1030_s25 = sshll.u32 %s1386_s30, 7 }
  0x42   : > { %s1763_s23 = scalar_select %p1537_p10, 1, 0 }
  0x43   : > { %s1543_s20 = sshll.u32 %s302_s24, 3  ;;  %s1548_s14 = scalar_lea.hbm %s1736_s0, %s1030_s25 }
  0x44   : > { %s306_s15 = scalar_lea.vmem [#allocation2], %s1543_s20  ;;  %p1551_p11 = pnand %p1099_p0, %p48_p5 }
  0x45   : > { %s313_s17 = sshll.u32 %s306_s15, 4  ;;  %s1558_s2 = scalar_lea.hbm %s1737_s1, %s1030_s25  ;;  %s314_s17 = int_to_ptr.vmem [resolvable:$true] %s313_s17 }
  0x46   : > { %s303_s26 = scalar_lea.sflag [#allocation3], %s302_s24  ;;  %s1224_s10 = scalar_lea.hbm %s1548_s14, 128 }
  0x47   : > { %p1225_p7 = scmp.ne.s32.totalorder %s1548_s14, %s1224_s10  ;;  %p1226_p1 = pneg %p1551_p11 }
  0x48   : > { %s1229_s5 = scalar_lea.hbm %s1736_s0, 256  ;;  %p1230_p2 = scmp.lt.s32.totalorder %s1548_s14, %s1736_s0 }
  0x49   : > { %p1227_p9 = pnand %p1226_p1, %p1225_p7  ;;  %p1231_p4 = scmp.lt.s32.totalorder %s1229_s5, %s1224_s10 }
  0x4b   : > { %p1228_p13 = pneg %p1227_p9  ;;  %p1232_p6 = por %p1231_p4, %p1230_p2 }
  0x4d   : > { %p1233_p12 = pnand %p1232_p6, %p1228_p13 }
  0x4f   : > { %1236 = shalt.err (!%p1233_p12)
}
  0x50   : > { %s1237_s24 = scalar_lea.vmem %s314_s17, 128  ;;  %s1393_s25 = smov [#allocation2]  }
  0x51   : > { %p1238_p0 = scmp.ne.s32.totalorder %s314_s17, %s1237_s24  ;;  %s1242_s21 = sshll.u32 %s1393_s25, 4  ;;  %s1243_s21 = int_to_ptr.vmem [resolvable:$false] %s1242_s21 }
  0x52   : > { %s1244_s4 = scalar_lea.vmem %s1243_s21, 256  ;;  %p1245_p7 = scmp.lt.s32.totalorder %s314_s17, %s1243_s21 }
  0x53   : > { %p1240_p5 = pnand %p1238_p0, %p1226_p1  ;;  %p1246_p9 = scmp.lt.s32.totalorder %s1244_s4, %s1237_s24 }
  0x55   : > { %p1241_p3 = pneg %p1240_p5  ;;  %p1247_p10 = por %p1246_p9, %p1245_p7 }
  0x57   : > { %p1248_p8 = pnand %p1247_p10, %p1241_p3 }
  0x59   : > { %1251 = shalt.err (!%p1248_p8)
}
  0x5a   : > { %1085 = dma.hbm_to_vmem [thread:$0]  (!%p1551_p11), %s1548_s14, 128, %s314_s17, %s303_s26  }
  0x5b   : > { %s320_s5 = sand.u32 1, %s1386_s30   ;;  %s324_s29 = scalar_lea.vmem [#allocation5], %s1543_s20 }
  0x5c   : > { %s331_s22 = sshll.u32 %s324_s29, 4  ;;  %s321_s16 = scalar_lea.sflag [#allocation6], %s320_s5  ;;  %s332_s22 = int_to_ptr.vmem [resolvable:$true] %s331_s22 }
  0x5d   : > { %s1252_s10 = scalar_lea.hbm %s1558_s2, 128  ;;  %s1257_s25 = scalar_lea.hbm %s1737_s1, 256 }
  0x5e   : > { %p1253_p13 = scmp.ne.s32.totalorder %s1558_s2, %s1252_s10  ;;  %p1258_p2 = scmp.lt.s32.totalorder %s1558_s2, %s1737_s1 }
  0x5f   : > { %p1259_p4 = scmp.lt.s32.totalorder %s1257_s25, %s1252_s10 }
  0x60   : > { %p1255_p8 = pnand %p1253_p13, %p1226_p1 }
  0x61   : > { %p1260_p6 = por %p1259_p4, %p1258_p2 }
  0x62   : > { %p1256_p10 = pneg %p1255_p8 }
  0x64   : > { %p1261_p12 = pnand %p1260_p6, %p1256_p10 }
  0x66   : > { %1264 = shalt.err (!%p1261_p12)
}
  0x67   : > { %s1265_s20 = scalar_lea.vmem %s332_s22, 128  ;;  %s1394_s14 = smov [#allocation5]  }
  0x68   : > { %p1266_p0 = scmp.ne.s32.totalorder %s332_s22, %s1265_s20  ;;  %s1270_s17 = sshll.u32 %s1394_s14, 4  ;;  %s1271_s17 = int_to_ptr.vmem [resolvable:$false] %s1270_s17 }
  0x69   : > { %s1272_s26 = scalar_lea.vmem %s1271_s17, 256  ;;  %p1273_p7 = scmp.lt.s32.totalorder %s332_s22, %s1271_s17 }
  0x6a   : > { %p1268_p5 = pnand %p1266_p0, %p1226_p1  ;;  %p1274_p9 = scmp.lt.s32.totalorder %s1272_s26, %s1265_s20 }
  0x6c   : > { %p1269_p3 = pneg %p1268_p5  ;;  %p1275_p13 = por %p1274_p9, %p1273_p7 }
  0x6e   : > { %p1276_p8 = pnand %p1275_p13, %p1269_p3 }
  0x70   : > { %1279 = shalt.err (!%p1276_p8)
}
  0x71   : > { %1088 = dma.hbm_to_vmem [thread:$0]  (!%p1551_p11), %s1558_s2, 128, %s332_s22, %s321_s16  }
  0x72   : > { %p1765_p10 = scmp.ne.s32.totalorder %s1756_s13, 0 }
  0x73   : > { %s1603_s5 = sand.u32 (!%p1765_p10), 1, %s1378_s28   ;;  %p1766_p1 = scmp.ne.s32.totalorder (!%p1765_p10), %s1754_s11, 0 }
  0x74   : > { %340 = sbr.rel (%p1765_p10) target bundleno = 939 (0x3ab), region = 48  ;;  %s1606_s29 = sshll.u32 (!%p1765_p10), %s1603_s5, 3 }
  0x75   : > { %s343_s10 = scalar_lea.sflag (!%p1765_p10), [#allocation3], %s1603_s5  ;;  %s346_s15 = scalar_lea.vmem (!%p1765_p10), [#allocation2], %s1606_s29 }
  0x79   : > { %1349 = dma.done.wait (%p1766_p1), %s343_s10, 128  }
  0x7a   : > { %1351 = vsyncadd (%p1766_p1), %s343_s10, 4294967168  ;;  %s351_s2 = sand.u32 1, %s1464_s9   ;;  %s355_s19 = scalar_lea.vmem [#allocation5], %s1606_s29 }
  0x7b   : > { %s352_s13 = scalar_lea.sflag [#allocation6], %s351_s2 }
  0x7c   : > { %1353 = dma.done.wait (%p1766_p1), %s352_s13, 128  }
  0x7d   : > { %1355 = vsyncadd (%p1766_p1), %s352_s13, 4294967168  ;;  %p1767_p11 = scmp.eq.s32.totalorder %s1464_s9, 0 }
  0x7f   : > { %1357 = dma.done.wait (%p1767_p11), [#allocation6], 8192   ;;  %p1768_p2 = pmov %p1767_p11 }
  0x81   : > { %1359 = vsyncadd (%p1768_p2), [#allocation6], 4294959104  ;;  %p1769_p4 = pmov %p1768_p2 }
  0x82   : > { %p1770_p6 = pmov %p1768_p2 }
  0x83   : > { %1361 = dma.done.wait (%p1769_p4), [#allocation9], 8224  }
  0x84   : > { %1363 = vsyncadd (%p1770_p6), [#allocation9], 4294959072  ;;  %v1395_v0 = vmov 0.0   ;;  %v475_v1 = vld [vmem:[#allocation7 + $0x1f8] sm:$0xff]  ;;  %v474_v2 = vld [vmem:[#allocation7 + $0x1f0] sm:$0xff]  ;;  %s1048_s14 = sshll.u32 %s1464_s9, 7 }
  0x85   : > { %540 = vmatprep.mubr.f32.mxu1 %v1395_v0  ;;  %v473_v3 = vld [vmem:[#allocation7 + $0x1e8] sm:$0xff]  ;;  %476 = vmatprep.subr.mxu1 %v475_v1  ;;  %v472_v4 = vld [vmem:[#allocation7 + $0x1e0] sm:$0xff]  ;;  %v471_v5 = vld [vmem:[#allocation7 + $0x1d8] sm:$0xff]  ;;  %s402_s17 = scalar_lea.vmem [#allocation11], %s1606_s29  ;;  %s409_s16 = scalar_lea.vmem [#allocation12], %s1606_s29 }
  0x86   : > { %477 = vmatpush1.msra.mxu1 %v474_v2  ;;  %v470_v6 = vld [vmem:[#allocation7 + $0x1d0] sm:$0xff]  ;;  %v469_v7 = vld [vmem:[#allocation7 + $0x1c8] sm:$0xff]  ;;  %v468_v8 = vld [vmem:[#allocation7 + $0x1c0] sm:$0xff]  ;;  %s857_s26 = sshll.u32 %s402_s17, 4  ;;  %s1674_s24 = sshll.u32 %s409_s16, 4  ;;  %s1666_s26 = int_to_ptr.vmem [resolvable:$true] %s857_s26  ;;  %s871_s24 = int_to_ptr.vmem [resolvable:$true] %s1674_s24 }
  0x87   : > { %478 = vmatprep.subr.mxu1 %v473_v3  ;;  %v467_v9 = vld [vmem:[#allocation7 + $0x1b8] sm:$0xff]  ;;  %v466_v10 = vld [vmem:[#allocation7 + $0x1b0] sm:$0xff]  ;;  %v465_v11 = vld [vmem:[#allocation7 + $0x1a8] sm:$0xff]  ;;  %s839_s25 = scalar_lea.sflag [#allocation4], %s1603_s5  ;;  %s1280_s21 = scalar_lea.vmem %s1666_s26, 128 }
  0x88   : > { %479 = vmatpush1.msra.mxu1 %v472_v4  ;;  %v464_v12 = vld [vmem:[#allocation7 + $0x1a0] sm:$0xff]  ;;  %v463_v13 = vld [vmem:[#allocation7 + $0x198] sm:$0xff]  ;;  %v462_v14 = vld [vmem:[#allocation7 + $0x190] sm:$0xff]  ;;  %p1281_p12 = scmp.ne.s32.totalorder %s1666_s26, %s1280_s21  ;;  %p1771_p0 = scmp.ne.s32.totalorder %s1763_s23, 0 }
  0x89   : > { %480 = vmatprep.subr.mxu1 %v471_v5  ;;  %v461_v15 = vld [vmem:[#allocation7 + $0x188] sm:$0xff]  ;;  %v460_v16 = vld [vmem:[#allocation7 + $0x180] sm:$0xff]  ;;  %v459_v17 = vld [vmem:[#allocation7 + $0x178] sm:$0xff]  ;;  %s1396_s4 = smov [#allocation11]  }
  0x8a   : > { %481 = vmatpush1.msra.mxu1 %v470_v6  ;;  %v458_v18 = vld [vmem:[#allocation7 + $0x170] sm:$0xff]  ;;  %v457_v19 = vld [vmem:[#allocation7 + $0x168] sm:$0xff]  ;;  %v456_v20 = vld [vmem:[#allocation7 + $0x160] sm:$0xff]  ;;  %p1282_p5 = pnand %p1281_p12, %p1771_p0  ;;  %s1284_s20 = sshll.u32 %s1396_s4, 4  ;;  %s1285_s20 = int_to_ptr.vmem [resolvable:$false] %s1284_s20 }
  0x8b   : > { %482 = vmatprep.subr.mxu1 %v469_v7  ;;  %v455_v21 = vld [vmem:[#allocation7 + $0x158] sm:$0xff]  ;;  %v454_v22 = vld [vmem:[#allocation7 + $0x150] sm:$0xff]  ;;  %v453_v23 = vld [vmem:[#allocation7 + $0x148] sm:$0xff]  ;;  %s1286_s10 = scalar_lea.vmem %s1285_s20, 256  ;;  %p1287_p7 = scmp.lt.s32.totalorder %s1666_s26, %s1285_s20 }
  0x8c   : > { %483 = vmatpush1.msra.mxu1 %v468_v8  ;;  %v452_v24 = vld [vmem:[#allocation7 + $0x140] sm:$0xff]  ;;  %v451_v25 = vld [vmem:[#allocation7 + $0x138] sm:$0xff]  ;;  %v664_v27 = vld [vmem:[#allocation8 + $0xf0] sm:$0xff]  ;;  %p1283_p3 = pneg %p1282_p5  ;;  %p1288_p9 = scmp.lt.s32.totalorder %s1286_s10, %s1280_s21 }
  0x8d   : > { %484 = vmatprep.subr.mxu1 %v467_v9  ;;  %v665_v26 = vld [vmem:[#allocation8 + $0xf8] sm:$0xff]  ;;  %v663_v28 = vld [vmem:[#allocation8 + $0xe8] sm:$0xff]  ;;  %v450_v29 = vld [vmem:[#allocation7 + $0x130] sm:$0xff] }
  0x8e   : > { %485 = vmatpush1.msra.mxu1 %v466_v10  ;;  %710 = vmatprep.subr.mxu0 %v665_v26  ;;  %v662_v30 = vld [vmem:[#allocation8 + $0xe0] sm:$0xff]  ;;  %v449_v31 = vld [vmem:[#allocation7 + $0x128] sm:$0xff]  ;;  %v661_v32 = vld [vmem:[#allocation8 + $0xd8] sm:$0xff]  ;;  %p1289_p13 = por %p1288_p9, %p1287_p7 }
  0x8f   : > { %486 = vmatprep.subr.mxu1 %v465_v11  ;;  %711 = vmatpush1.msra.mxu0 %v664_v27  ;;  %v448_v33 = vld [vmem:[#allocation7 + $0x120] sm:$0xff]  ;;  %v660_v34 = vld [vmem:[#allocation8 + $0xd0] sm:$0xff]  ;;  %v447_v35 = vld [vmem:[#allocation7 + $0x118] sm:$0xff] }
  0x90   : > { %487 = vmatpush1.msra.mxu1 %v464_v12  ;;  %712 = vmatprep.subr.mxu0 %v663_v28  ;;  %v659_v36 = vld [vmem:[#allocation8 + $0xc8] sm:$0xff]  ;;  %v446_v37 = vld [vmem:[#allocation7 + $0x110] sm:$0xff]  ;;  %v658_v38 = vld [vmem:[#allocation8 + $0xc0] sm:$0xff]  ;;  %p1290_p8 = pnand %p1289_p13, %p1283_p3 }
  0x91   : > { %488 = vmatprep.subr.mxu1 %v463_v13  ;;  %713 = vmatpush1.msra.mxu0 %v662_v30  ;;  %v445_v39 = vld [vmem:[#allocation7 + $0x108] sm:$0xff]  ;;  %v657_v40 = vld [vmem:[#allocation8 + $0xb8] sm:$0xff]  ;;  %v444_v41 = vld [vmem:[#allocation7 + $0x100] sm:$0xff] }
  0x92   : > { %489 = vmatpush1.msra.mxu1 %v462_v14  ;;  %714 = vmatprep.subr.mxu0 %v661_v32  ;;  %v656_v42 = vld [vmem:[#allocation8 + $0xb0] sm:$0xff]  ;;  %v443_v44 = vld [vmem:[#allocation7 + $0xf8] sm:$0xff]  ;;  %v441_v46 = vld [vmem:[#allocation7 + $0xe8] sm:$0xff] }
  0x93   : > { %490 = vmatprep.subr.mxu1 %v461_v15  ;;  %715 = vmatpush1.msra.mxu0 %v660_v34  ;;  %v1631_v43 = vld [vmem:[%s355_s19] sm:$0xff]  ;;  %v655_v47 = vld [vmem:[#allocation8 + $0xa8] sm:$0xff]  ;;  %v440_v48 = vld [vmem:[#allocation7 + $0xe0] sm:$0xff]  ;;  %s1664_s19 = scalar_lea.hbm %s1743_s7, %s1048_s14 }
  0x94   : > { %491 = vmatpush1.msra.mxu1 %v460_v16  ;;  %716 = vmatprep.subr.mxu0 %v659_v36  ;;  %v442_v45 = vld [vmem:[#allocation7 + $0xf0] sm:$0xff]  ;;  %v654_v49 = vld [vmem:[#allocation8 + $0xa0] sm:$0xff]  ;;  %v439_v50 = vld [vmem:[#allocation7 + $0xd8] sm:$0xff] }
  0x95   : > { %492 = vmatprep.subr.mxu1 %v459_v17  ;;  %717 = vmatpush1.msra.mxu0 %v658_v38  ;;  %v653_v51 = vld [vmem:[#allocation8 + $0x98] sm:$0xff]  ;;  %v438_v52 = vld [vmem:[#allocation7 + $0xd0] sm:$0xff]  ;;  %v437_v54 = vld [vmem:[#allocation7 + $0xc8] sm:$0xff] }
  0x96   : > { %493 = vmatpush1.msra.mxu1 %v458_v18  ;;  %718 = vmatprep.subr.mxu0 %v657_v40  ;;  %v652_v53 = vld [vmem:[#allocation8 + $0x90] sm:$0xff]  ;;  %v651_v55 = vld [vmem:[#allocation8 + $0x88] sm:$0xff]  ;;  %v436_v56 = vld [vmem:[#allocation7 + $0xc0] sm:$0xff] }
  0x97   : > { %494 = vmatprep.subr.mxu1 %v457_v19  ;;  %719 = vmatpush1.msra.mxu0 %v656_v42  ;;  %v650_v57 = vld [vmem:[#allocation8 + $0x80] sm:$0xff]  ;;  %v435_v58 = vld [vmem:[#allocation7 + $0xb8] sm:$0xff]  ;;  %v434_v60 = vld [vmem:[#allocation7 + $0xb0] sm:$0xff] }
  0x98   : > { %495 = vmatpush1.msra.mxu1 %v456_v20  ;;  %720 = vmatprep.subr.mxu0 %v655_v47  ;;  %v649_v59 = vld [vmem:[#allocation8 + $0x78] sm:$0xff]  ;;  %v648_v61 = vld [vmem:[#allocation8 + $0x70] sm:$0xff]  ;;  %v433_v62 = vld [vmem:[#allocation7 + $0xa8] sm:$0xff] }
  0x99   : > { %496 = vmatprep.subr.mxu1 %v455_v21  ;;  %721 = vmatpush1.msra.mxu0 %v654_v49  ;;  %v647_v63 = vld [vmem:[#allocation8 + $0x68] sm:$0xff]  ;;  %v646_v1 = vld [vmem:[#allocation8 + $0x60] sm:$0xff]  ;;  %v431_v2 = vld [vmem:[#allocation7 + $0x98] sm:$0xff] }
  0x9a   : > { %497 = vmatpush1.msra.mxu1 %v454_v22  ;;  %722 = vmatprep.subr.mxu0 %v653_v51  ;;  %v645_v3 = vld [vmem:[#allocation8 + $0x58] sm:$0xff]  ;;  %v430_v4 = vld [vmem:[#allocation7 + $0x90] sm:$0xff]  ;;  %v429_v6 = vld [vmem:[#allocation7 + $0x88] sm:$0xff] }
  0x9b   : > { %498 = vmatprep.subr.mxu1 %v453_v23  ;;  %723 = vmatpush1.msra.mxu0 %v652_v53  ;;  %v644_v5 = vld [vmem:[#allocation8 + $0x50] sm:$0xff]  ;;  %v428_v7 = vld [vmem:[#allocation7 + $0x80] sm:$0xff]  ;;  %v427_v8 = vld [vmem:[#allocation7 + $0x78] sm:$0xff] }
  0x9c   : > { %499 = vmatpush1.msra.mxu1 %v452_v24  ;;  %724 = vmatprep.subr.mxu0 %v651_v55  ;;  %v426_v9 = vld [vmem:[#allocation7 + $0x70] sm:$0xff]  ;;  %v425_v10 = vld [vmem:[#allocation7 + $0x68] sm:$0xff]  ;;  %v424_v11 = vld [vmem:[#allocation7 + $0x60] sm:$0xff] }
  0x9d   : > { %500 = vmatprep.subr.mxu1 %v451_v25  ;;  %725 = vmatpush1.msra.mxu0 %v650_v57  ;;  %v423_v12 = vld [vmem:[#allocation7 + $0x58] sm:$0xff]  ;;  %v422_v13 = vld [vmem:[#allocation7 + $0x50] sm:$0xff]  ;;  %v421_v14 = vld [vmem:[#allocation7 + $0x48] sm:$0xff] }
  0x9e   : > { %501 = vmatpush1.msra.mxu1 %v450_v29  ;;  %726 = vmatprep.subr.mxu0 %v649_v59  ;;  %v420_v15 = vld [vmem:[#allocation7 + $0x40] sm:$0xff]  ;;  %v419_v16 = vld [vmem:[#allocation7 + $0x38] sm:$0xff]  ;;  %v418_v17 = vld [vmem:[#allocation7 + $0x30] sm:$0xff] }
  0x9f   : > { %502 = vmatprep.subr.mxu1 %v449_v31  ;;  %727 = vmatpush1.msra.mxu0 %v648_v61  ;;  %v417_v18 = vld [vmem:[#allocation7 + $0x28] sm:$0xff]  ;;  %v416_v19 = vld [vmem:[#allocation7 + $0x20] sm:$0xff]  ;;  %v415_v20 = vld [vmem:[#allocation7 + $0x18] sm:$0xff] }
  0xa0   : > { %503 = vmatpush1.msra.mxu1 %v448_v33  ;;  %728 = vmatprep.subr.mxu0 %v647_v63  ;;  %v414_v21 = vld [vmem:[#allocation7 + $0x10] sm:$0xff]  ;;  %v413_v22 = vld [vmem:[#allocation7 + $0x8] sm:$0xff]  ;;  %v412_v23 = vld [vmem:[#allocation7] sm:$0xff] }
  0xa1   : > { %504 = vmatprep.subr.mxu1 %v447_v35  ;;  %729 = vmatpush1.msra.mxu0 %v646_v1  ;;  %v1637_v24 = vld [vmem:[%s346_s15] sm:$0xff]  ;;  %v641_v27 = vld [vmem:[#allocation8 + $0x38] sm:$0xff]  ;;  %v640_v28 = vld [vmem:[#allocation8 + $0x30] sm:$0xff] }
  0xa2   : > { %505 = vmatpush1.msra.mxu1 %v446_v37  ;;  %730 = vmatprep.subr.mxu0 %v645_v3  ;;  %v643_v25 = vld [vmem:[#allocation8 + $0x48] sm:$0xff]  ;;  %v642_v26 = vld [vmem:[#allocation8 + $0x40] sm:$0xff]  ;;  %v637_v31 = vld [vmem:[#allocation8 + $0x18] sm:$0xff] }
  0xa3   : > { %506 = vmatprep.subr.mxu1 %v445_v39  ;;  %731 = vmatpush1.msra.mxu0 %v644_v5  ;;  %v639_v29 = vld [vmem:[#allocation8 + $0x28] sm:$0xff]  ;;  %v638_v30 = vld [vmem:[#allocation8 + $0x20] sm:$0xff]  ;;  %v636_v32 = vld [vmem:[#allocation8 + $0x10] sm:$0xff] }
  0xa4   : > { %507 = vmatpush1.msra.mxu1 %v444_v41  ;;  %732 = vmatprep.subr.mxu0 %v643_v25  ;;  %v635_v33 = vld [vmem:[#allocation8 + $0x8] sm:$0xff]  ;;  %v634_v34 = vld [vmem:[#allocation8] sm:$0xff]  ;;  %v697_v35 = vld [vmem:[#allocation8 + $0x1f8] sm:$0xff] }
  0xa5   : > { %541 = vmatmul.mubr.f32.vlgmr.msra.gmra.mxu1 %v1631_v43  ;;  %547 = vmatprep.subr.mxu1 %v443_v44  ;;  %v696_v36 = vld [vmem:[#allocation8 + $0x1f0] sm:$0xff]  ;;  %v695_v37 = vld [vmem:[#allocation8 + $0x1e8] sm:$0xff]  ;;  %v694_v38 = vld [vmem:[#allocation8 + $0x1e0] sm:$0xff] }
  0xa6   : > { %548 = vmatpush1.msra.mxu1 %v442_v45  ;;  %611 = vmatprep.mubr.f32.mxu1 %v1395_v0  ;;  %v432_v0 = vld [vmem:[#allocation7 + $0xa0] sm:$0xff]  ;;  %v693_v39 = vld [vmem:[#allocation8 + $0x1d8] sm:$0xff]  ;;  %v692_v40 = vld [vmem:[#allocation8 + $0x1d0] sm:$0xff] }
  0xa7   : > { %549 = vmatprep.subr.mxu1 %v441_v46  ;;  %733 = vmatpush1.msra.mxu0 %v642_v26  ;;  %v691_v41 = vld [vmem:[#allocation8 + $0x1c8] sm:$0xff]  ;;  %v690_v42 = vld [vmem:[#allocation8 + $0x1c0] sm:$0xff]  ;;  %v689_v44 = vld [vmem:[#allocation8 + $0x1b8] sm:$0xff] }
  0xa8   : > { %550 = vmatpush1.msra.mxu1 %v440_v48  ;;  %734 = vmatprep.subr.mxu0 %v641_v27  ;;  %v688_v45 = vld [vmem:[#allocation8 + $0x1b0] sm:$0xff]  ;;  %v687_v46 = vld [vmem:[#allocation8 + $0x1a8] sm:$0xff]  ;;  %v686_v47 = vld [vmem:[#allocation8 + $0x1a0] sm:$0xff] }
  0xa9   : > { %551 = vmatprep.subr.mxu1 %v439_v50  ;;  %735 = vmatpush1.msra.mxu0 %v640_v28  ;;  %v685_v48 = vld [vmem:[#allocation8 + $0x198] sm:$0xff]  ;;  %v684_v49 = vld [vmem:[#allocation8 + $0x190] sm:$0xff]  ;;  %v683_v50 = vld [vmem:[#allocation8 + $0x188] sm:$0xff] }
  0xaa   : > { %552 = vmatpush1.msra.mxu1 %v438_v52  ;;  %736 = vmatprep.subr.mxu0 %v639_v29  ;;  %v682_v51 = vld [vmem:[#allocation8 + $0x180] sm:$0xff]  ;;  %v681_v52 = vld [vmem:[#allocation8 + $0x178] sm:$0xff]  ;;  %v680_v53 = vld [vmem:[#allocation8 + $0x170] sm:$0xff] }
  0xab   : > { %553 = vmatprep.subr.mxu1 %v437_v54  ;;  %737 = vmatpush1.msra.mxu0 %v638_v30  ;;  %v679_v54 = vld [vmem:[#allocation8 + $0x168] sm:$0xff]  ;;  %v678_v55 = vld [vmem:[#allocation8 + $0x160] sm:$0xff]  ;;  %v676_v57 = vld [vmem:[#allocation8 + $0x150] sm:$0xff] }
  0xac   : > { %554 = vmatpush1.msra.mxu1 %v436_v56  ;;  %738 = vmatprep.subr.mxu0 %v637_v31  ;;  %v677_v56 = vld [vmem:[#allocation8 + $0x158] sm:$0xff]  ;;  %v674_v59 = vld [vmem:[#allocation8 + $0x140] sm:$0xff]  ;;  %v672_v61 = vld [vmem:[#allocation8 + $0x130] sm:$0xff] }
  0xad   : > { %555 = vmatprep.subr.mxu1 %v435_v58  ;;  %739 = vmatpush1.msra.mxu0 %v636_v32  ;;  %v675_v58 = vld [vmem:[#allocation8 + $0x148] sm:$0xff]  ;;  %v670_v63 = vld [vmem:[#allocation8 + $0x120] sm:$0xff]  ;;  %v668_v1 = vld [vmem:[#allocation8 + $0x110] sm:$0xff] }
  0xae   : > { %556 = vmatpush1.msra.mxu1 %v434_v60  ;;  %740 = vmatprep.subr.mxu0 %v635_v33  ;;  %v673_v60 = vld [vmem:[#allocation8 + $0x138] sm:$0xff]  ;;  %v666_v3 = vld [vmem:[#allocation8 + $0x100] sm:$0xff] }
  0xaf   : > { %557 = vmatprep.subr.mxu1 %v433_v62  ;;  %741 = vmatpush1.msra.mxu0 %v634_v34  ;;  %v671_v62 = vld [vmem:[#allocation8 + $0x128] sm:$0xff]  ;;  %v1041_v33 = vld [vmem:[%s1742_s6 + $0x4] ss:$0 sm:$0xff] }
  0xb0   : > { %558 = vmatpush1.msra.mxu1 %v432_v0  ;;  %742 = vmatprep.subr.mxu0 %v697_v35  ;;  %v669_v0 = vld [vmem:[#allocation8 + $0x118] sm:$0xff] }
  0xb1   : > { %559 = vmatprep.subr.mxu1 %v431_v2  ;;  %743 = vmatpush2.msra.mxu0 %v696_v36  ;;  %v667_v2 = vld [vmem:[#allocation8 + $0x108] sm:$0xff] }
  0xb2   : > { %560 = vmatpush1.msra.mxu1 %v430_v4  ;;  %744 = vmatprep.subr.mxu0 %v695_v37  ;;  %v620_v4 = vlaneseq }
  0xb3   : > { %561 = vmatprep.subr.mxu1 %v429_v6  ;;  %745 = vmatpush2.msra.mxu0 %v694_v38 }
  0xb4   : > { %562 = vmatpush1.msra.mxu1 %v428_v7  ;;  %746 = vmatprep.subr.mxu0 %v693_v39  ;;  %v621_v5 = vshrl.u32 %v620_v4, 7 }
  0xb5   : > { %563 = vmatprep.subr.mxu1 %v427_v8  ;;  %747 = vmatpush2.msra.mxu0 %v692_v40  ;;  %v618_v8 = vld [vmem:[%s1739_s3] sm:$0x3] }
  0xb6   : > { %564 = vmatpush1.msra.mxu1 %v426_v9  ;;  %748 = vmatprep.subr.mxu0 %v691_v41  ;;  %v622_v7 = vsub.s32 0, %v621_v5  ;;  %v626_v9 = vsub.s32 1, %v621_v5 }
  0xb7   : > { %565 = vmatprep.subr.mxu1 %v425_v10  ;;  %749 = vmatpush2.msra.mxu0 %v690_v42 }
  0xb8   : > { %566 = vmatpush1.msra.mxu1 %v424_v11  ;;  %750 = vmatprep.subr.mxu0 %v689_v44 }
  0xb9   : > { %567 = vmatprep.subr.mxu1 %v423_v12  ;;  %751 = vmatpush2.msra.mxu0 %v688_v45  ;;  %v623_v12 = vrot.slane %v618_v8, %v622_v7 }
  0xba   : > { %568 = vmatpush1.msra.mxu1 %v422_v13  ;;  %752 = vmatprep.subr.mxu0 %v687_v46 }
  0xbb   : > { %569 = vmatprep.subr.mxu1 %v421_v14  ;;  %753 = vmatpush2.msra.mxu0 %v686_v47  ;;  %v627_v14 = vrot.slane %v618_v8, %v626_v9 }
  0xbc   : > { %570 = vmatpush1.msra.mxu1 %v420_v15  ;;  %754 = vmatprep.subr.mxu0 %v685_v48  ;;  %v1042_v48 = vld [vmem:[%s1742_s6] ss:$0 sm:$0xff] }
  0xbd   : > { %571 = vmatprep.subr.mxu1 %v419_v16  ;;  %755 = vmatpush2.msra.mxu0 %v684_v49 }
  0xbe   : > { %572 = vmatpush1.msra.mxu1 %v418_v17  ;;  %756 = vmatprep.subr.mxu0 %v683_v50  ;;  %v1043_v50 = vld [vmem:[%s1742_s6 + $0x1] ss:$0 sm:$0xff] }
  0xbf   : > { %573 = vmatprep.subr.mxu1 %v417_v18  ;;  %757 = vmatpush2.msra.mxu0 %v682_v51 }
  0xc0   : > { %574 = vmatpush1.msra.mxu1 %v416_v19  ;;  %758 = vmatprep.subr.mxu0 %v681_v52 }
  0xc1   : > { %575 = vmatprep.subr.mxu1 %v415_v20  ;;  %759 = vmatpush2.msra.mxu0 %v680_v53  ;;  %v1044_v53 = vld [vmem:[%s1742_s6 + $0x2] ss:$0 sm:$0xff] }
  0xc2   : > { %576 = vmatpush1.msra.mxu1 %v414_v21  ;;  %760 = vmatprep.subr.mxu0 %v679_v54  ;;  %v698_v21 = vld [vmem:[#allocation10] sm:$0x3] }
  0xc3   : > { %577 = vmatprep.subr.mxu1 %v413_v22  ;;  %761 = vmatpush2.msra.mxu0 %v678_v55  ;;  %v703_v22 = vrot.slane %v698_v21, %v622_v7 }
  0xc4   : > { %578 = vmatpush1.msra.mxu1 %v412_v23  ;;  %762 = vmatprep.subr.mxu0 %v677_v56  ;;  %v707_v23 = vrot.slane %v698_v21, %v626_v9  ;;  %v1045_v56 = vld [vmem:[%s1742_s6 + $0x3] ss:$0 sm:$0xff] }
  0xc5   : > { %612 = vmatmul.mubr.f32.vlgmr.msra.gmra.mxu1 %v1637_v24  ;;  %763 = vmatpush2.msra.mxu0 %v676_v57 }
  0xc6   : > { %764 = vmatprep.subr.mxu0 %v675_v58 }
  0xc7   : > { %765 = vmatpush2.msra.mxu0 %v674_v59 }
  0xc8   : > { %766 = vmatprep.subr.mxu0 %v673_v60 }
  0xc9   : > { %767 = vmatpush2.msra.mxu0 %v672_v61 }
  0xca   : > { %768 = vmatprep.subr.mxu0 %v671_v62 }
  0xcb   : > { %769 = vmatpush2.msra.mxu0 %v670_v63 }
  0xcc   : > { %770 = vmatprep.subr.mxu0 %v669_v0 }
  0xcd   : > { %771 = vmatpush2.msra.mxu0 %v668_v1 }
  0xce   : > { %772 = vmatprep.subr.mxu0 %v667_v2 }
  0xcf   : > { %773 = vmatpush2.msra.mxu0 %v666_v3 }
 0x165   : > { %v542_v6 = vpop.f32.mrf.mxu1 }
 0x167   : > { %v544_v10 = vpop.f32.mrf.mxu1 }
 0x185   : > { %v613_v11 = vpop.f32.mrf.mxu1 }
 0x186   : > { %v614_v13 = vadd.f32 %v613_v11, %v542_v6 }
 0x187   : > { %v615_v15 = vpop.f32.mrf.mxu1 }
 0x188   : > { %v616_v16 = vadd.f32 %v615_v15, %v544_v10  ;;  %v630_v17 = vadd.f32 %v623_v12, %v614_v13 }
 0x18a   : > { %v631_v18 = vadd.f32 %v627_v14, %v616_v16  ;;  %v632_v20 = vmax.f32 %v630_v17, 0.0 }
 0x18c   : > { %v633_v19 = vmax.f32 %v631_v18, 0.0 }
 0x18e   : > { %774 = vmatprep.mubr.f32.mxu0 %v633_v19 }
 0x18f   : > { %775 = vmatmul.mubr.f32.vlgmr.msra.gmra.mxu0 %v632_v20 }
 0x24f   : > { %v776_v25 = vpop.f32.mrf.mxu0 }
 0x250   : > { %v777_v26 = vadd.f32 %v776_v25, %v703_v22 }
 0x251   : > { %v778_v27 = vpop.f32.mrf.mxu0 }
 0x252   : > { %v779_v28 = vadd.f32 %v778_v27, %v707_v23  ;;  %v781_v29 = vadd.f32 %v777_v26, %v1637_v24 }
 0x254   : > { %788 = vadd.xlane.f32.xlu0 %v781_v29  ;;  %v782_v30 = vadd.f32 %v779_v28, %v1631_v43 }
 0x258   : > { %815 = vadd.xlane.f32.xlu0 %v782_v30 }
 0x2dd   : > { %v789_v31 = vpop.xlane.xlu0 %788 }
 0x2de   : > { %v790_v32 = vmul.f32 0.03125, %v789_v31 }
 0x2e0   : > { %v791_v34 = vsub.f32 %v781_v29, %v790_v32 }
 0x2e1   : > { %v816_v35 = vpop.xlane.xlu0 %815 }
 0x2e2   : > { %v817_v36 = vmul.f32 0.03125, %v816_v35  ;;  %v796_v37 = vmul.f32 %v1041_v33, %v791_v34 }
 0x2e4   : > { %v818_v38 = vsub.f32 %v782_v30, %v817_v36  ;;  %v797_v39 = vmul.f32 %v796_v37, %v796_v37 }
 0x2e6   : > { %798 = vadd.xlane.f32.xlu1 %v797_v39  ;;  %v819_v40 = vmul.f32 %v1041_v33, %v818_v38 }
 0x2e8   : > { %v820_v24 = vmul.f32 %v819_v40, %v819_v40 }
 0x2ea   : > { %821 = vadd.xlane.f32.xlu1 %v820_v24 }
 0x36f   : > { %v799_v43 = vpop.xlane.xlu1 %798 }
 0x370   : > { %v800_v41 = vmul.f32 0.03125, %v799_v43 }
 0x372   : > { %v801_v42 = vadd.f32 1e-06, %v800_v41 }
 0x373   : > { %v822_v44 = vpop.xlane.xlu1 %821 }
 0x374   : > { %1142 = vrsqrt.f32 %v801_v42  ;;  %v823_v45 = vmul.f32 0.03125, %v822_v44 }
 0x376   : > { %v824_v46 = vadd.f32 1e-06, %v823_v45 }
 0x378   : > { %1144 = vrsqrt.f32 %v824_v46 }
 0x381   : > { %v1143_v47 = vpop.eup %1142 }
 0x382   : > { %v803_v49 = vmul.f32 %v1143_v47, %v796_v37 }
 0x384   : > { %v808_v51 = vmul.f32 %v1042_v48, %v803_v49 }
 0x385   : > { %v1145_v52 = vpop.eup %1144 }
 0x386   : > { %v813_v54 = vadd.f32 %v1043_v50, %v808_v51  ;;  %v826_v55 = vmul.f32 %v1145_v52, %v819_v40 }
 0x388   : > { %814 = vst [vmem:[%s402_s17] sm:$0xff] %v813_v54  ;;  %v831_v57 = vmul.f32 %v1044_v53, %v826_v55 }
 0x389   : > { %1293 = shalt.err (!%p1290_p8)
}
 0x38a   : > { %s1294_s17 = scalar_lea.hbm %s1664_s19, 128  ;;  %s1298_s13 = scalar_lea.hbm %s1743_s7, 256 }
 0x38b   : > { %p1295_p10 = scmp.ne.s32.totalorder %s1664_s19, %s1294_s17  ;;  %p1299_p2 = scmp.lt.s32.totalorder %s1664_s19, %s1743_s7 }
 0x38c   : > { %p1300_p4 = scmp.lt.s32.totalorder %s1298_s13, %s1294_s17 }
 0x38d   : > { %p1296_p1 = pnand %p1295_p10, %p1771_p0 }
 0x38e   : > { %p1301_p6 = por %p1300_p4, %p1299_p2 }
 0x38f   : > { %p1297_p11 = pneg %p1296_p1 }
 0x391   : > { %p1302_p12 = pnand %p1301_p6, %p1297_p11 }
 0x393   : > { %1305 = shalt.err (!%p1302_p12)
}
 0x394   : > { %1068 = dma.vmem_to_hbm [thread:$0]  (%p1771_p0), %s1666_s26, 128, %s1664_s19, %s839_s25   ;;  %v836_v58 = vadd.f32 %v1045_v56, %v831_v57 }
 0x395   : > { %s868_s20 = scalar_lea.hbm %s1744_s8, %s1048_s14  ;;  %s844_s10 = scalar_lea.sflag [#allocation13], %s1603_s5 }
 0x396   : > { %837 = vst [vmem:[%s409_s16] sm:$0xff] %v836_v58  ;;  %s1306_s17 = scalar_lea.vmem %s871_s24, 128  ;;  %s1397_s15 = smov [#allocation12]  }
 0x397   : > { %p1307_p5 = scmp.ne.s32.totalorder %s871_s24, %s1306_s17  ;;  %s1310_s2 = sshll.u32 %s1397_s15, 4  ;;  %s1311_s2 = int_to_ptr.vmem [resolvable:$false] %s1310_s2 }
 0x398   : > { %s1312_s13 = scalar_lea.vmem %s1311_s2, 256  ;;  %p1313_p9 = scmp.lt.s32.totalorder %s871_s24, %s1311_s2 }
 0x399   : > { %p1308_p3 = pnand %p1307_p5, %p1771_p0  ;;  %p1314_p13 = scmp.lt.s32.totalorder %s1312_s13, %s1306_s17 }
 0x39b   : > { %p1309_p7 = pneg %p1308_p3  ;;  %p1315_p8 = por %p1314_p13, %p1313_p9 }
 0x39d   : > { %p1316_p10 = pnand %p1315_p8, %p1309_p7 }
 0x39f   : > { %1319 = shalt.err (!%p1316_p10)
}
 0x3a0   : > { %s1320_s9 = scalar_lea.hbm %s868_s20, 128  ;;  %s1324_s14 = scalar_lea.hbm %s1744_s8, 256 }
 0x3a1   : > { %p1321_p1 = scmp.ne.s32.totalorder %s868_s20, %s1320_s9  ;;  %p1325_p4 = scmp.lt.s32.totalorder %s868_s20, %s1744_s8 }
 0x3a2   : > { %p1326_p6 = scmp.lt.s32.totalorder %s1324_s14, %s1320_s9 }
 0x3a3   : > { %p1322_p11 = pnand %p1321_p1, %p1771_p0 }
 0x3a4   : > { %p1327_p12 = por %p1326_p6, %p1325_p4 }
 0x3a5   : > { %p1323_p2 = pneg %p1322_p11 }
 0x3a7   : > { %p1328_p5 = pnand %p1327_p12, %p1323_p2 }
 0x3a9   : > { %1331 = shalt.err (!%p1328_p5)
}
 0x3aa   : > { %1069 = dma.vmem_to_hbm [thread:$0]  (%p1771_p0), %s871_s24, 128, %s868_s20, %s844_s10  }
 0x3ab PF: > { %s882_s16 = sand.u32 1, %s1374_s27   ;;  %p1772_p3 = scmp.ne.s32.totalorder %s1755_s12, 0 }
 0x3ac   : > { %p1773_p7 = scmp.ge.s32.totalorder %s1386_s30, 2  ;;  %s883_s25 = scalar_lea.sflag [#allocation4], %s882_s16 }
 0x3ae   : > { %p1090_p9 = pnand %p1773_p7, %p1772_p3 }
 0x3b0   : > { %p1091_p13 = pneg %p1090_p9 }
 0x3b2   : > { %1365 = dma.done.wait (%p1091_p13), %s883_s25, 128  }
 0x3b3   : > { %1367 = vsyncadd (%p1091_p13), %s883_s25, 4294967168  ;;  %s892_s11 = scalar_lea.sflag [#allocation13], %s882_s16 }
 0x3b4   : > { %1369 = dma.done.wait (%p1091_p13), %s892_s11, 128  }
 0x3b5   : > { %1371 = vsyncadd (%p1091_p13), %s892_s11, 4294967168  ;;  %s1774_s22 = sld [smem:[#allocation20_spill]]  ;;  %p29_p0 = scmp.ge.s32.totalorder %s1523_s18, 4  }
 0x3b6   : > { %s1775_s29 = sld [smem:[#allocation21_spill]]  ;;  %s1776_s27 = smov %s1378_s28 }
 0x3b7   : > { %s1778_s30 = smov %s1523_s18  ;;  %31 = sbr.rel (!%p29_p0) target bundleno = 14 (0xe), region = 135 }
 0x3bb   : > { %s1777_s28 = smov %s1774_s22 }
 0x3bc   :  { %897 = vsyncpa [#allocation3], 1 }
 0x3bd   :  { %899 = vsyncpa [#allocation3 + $0x1], 1 }
 0x3be   :  { %900 = vsyncpa [#allocation6], 1 }
 0x3bf   :  { %902 = vsyncpa [#allocation6 + $0x1], 1 }
 0x3c0   :  { %903 = vsyncpa [#allocation9], 1 }
 0x3c1   :  { %904 = vsyncpa [#allocation4], 1 }
 0x3c2   :  { %906 = vsyncpa [#allocation4 + $0x1], 1 }
 0x3c3   :  { %907 = vsyncpa [#allocation13], 1 }
 0x3c4   :  { %909 = vsyncpa [#allocation13 + $0x1], 1 }

</bundles_post_ra>
